<compile_context>
chip_gen: v7x
topology: tpu7x:2x2x1
jax: 0.10.0
libtpu: 0.0.40
codegen_flags: <defaults>
</compile_context>

<pallas_src>
import jax
import jax.numpy as jnp
from jax.experimental import pallas as pl
from jax.experimental.pallas import tpu as pltpu


def _aspect_ratio_embed_kernel(ids_ref, hidden_ref, emb_ref, out_ref):
    # hidden_ref: (1, 1, TP, H) slab; emb_ref: (1, 1, 1, H) f32, broadcast over
    # the TP sublanes. f32 math, single cast at the store (lane-dense H).
    h = hidden_ref[...].astype(jnp.float32)
    out_ref[...] = (h + emb_ref[...]).astype(out_ref.dtype)


def _default_block_bytes():
    """Per-block byte budget: conservative on v5-and-older, larger on v6e/v7x."""
    try:
        kind = jax.devices()[0].device_kind.lower()
    except Exception:  # pragma: no cover - fall back to the safe budget
        kind = ""
    if any(tag in kind for tag in ("v2", "v3", "v4", "v5")):
        # 2.5 MiB blocks -> ~10 MiB double-buffered in+out < 16 MiB default scoped VMEM.
        return 5 * (1 << 19)
    # v6e / v7x: 5 MiB blocks -> ~20 MiB < 32 MiB default scoped VMEM.
    return 5 * (1 << 20)


def _select_patch_tile(P, H, itemsize, target_block_bytes):
    """Balance-aware patch tile: (TP, n_p_tiles)."""
    # Sublane alignment so the BlockSpec divisibility constraint holds even for
    # partial (masked) last tiles.
    if itemsize >= 4:
        align = 8
    elif itemsize == 2:
        align = 16
    else:
        align = 32
    row_bytes = H * itemsize
    tp_cap = max(align, int(target_block_bytes // max(row_bytes, 1)))
    if P <= tp_cap:
        return P, 1                      # full patch dim: always a legal block shape
    n_p = -(-P // tp_cap)                # cdiv
    tp = -(-P // n_p)                    # balanced rows per tile
    tp = ((tp + align - 1) // align) * align
    return tp, -(-P // tp)


def aspect_ratio_embedding(hidden_state, aspect_ratio_ids, embedding_table,
                           gate=None, *, is_gated=True, target_block_bytes=None):
    """
    hidden_state:      [B, T, P, H]   (f32 or bf16)
    aspect_ratio_ids:  i32[B]
    embedding_table:   [max_aspect_ratio_id + 1, T * H]
    gate:              f32[1] (required iff is_gated)
    returns:           same shape/dtype as hidden_state
    """
    B, T, P, H = hidden_state.shape
    num_emb = embedding_table.shape[0]

    # Broadcast-ready gather layout: (num_emb, T, 1, H), kept in f32; gate is
    # folded into the tiny table outside the kernel (no per-step EUP tanh, no
    # extra low-precision rounding).
    emb = embedding_table.reshape(num_emb, T, 1, H).astype(jnp.float32)
    if is_gated:
        emb = emb * jnp.tanh(gate.astype(jnp.float32))

    # Guard against out-of-range ids turning into bad HBM block indices.
    ids = jnp.clip(aspect_ratio_ids.astype(jnp.int32), 0, num_emb - 1)

    itemsize = jnp.dtype(hidden_state.dtype).itemsize
    if target_block_bytes is None:
        target_block_bytes = _default_block_bytes()
    TP, n_p = _select_patch_tile(P, H, itemsize, target_block_bytes)
    grid = (B, T, n_p)  # p innermost: emb block index constant across inner loop

    grid_spec = pltpu.PrefetchScalarGridSpec(
        num_scalar_prefetch=1,
        grid=grid,
        in_specs=[
            # hidden_state: one (1, 1, TP, H) slab per grid step
            pl.BlockSpec((1, 1, TP, H), lambda b, t, p, ids: (b, t, p, 0)),
            # embedding row: chosen by prefetched aspect_ratio_ids, fixed across p
            pl.BlockSpec((1, 1, 1, H), lambda b, t, p, ids: (ids[b], t, 0, 0)),
        ],
        out_specs=pl.BlockSpec((1, 1, TP, H), lambda b, t, p, ids: (b, t, p, 0)),
    )

    return pl.pallas_call(
        _aspect_ratio_embed_kernel,
        out_shape=jax.ShapeDtypeStruct((B, T, P, H), hidden_state.dtype),
        grid_spec=grid_spec,
        # hidden_state (call arg index 1: ids=0, hidden=1, emb=2) aliases output 0.
        input_output_aliases={1: 0},
        compiler_params=pltpu.CompilerParams(
            dimension_semantics=("parallel", "parallel", "parallel")),
    )(ids, hidden_state, emb)


def reference(hidden_state, aspect_ratio_ids, embedding_table, gate=None, *,
              is_gated=True):
    B, T, P, H = hidden_state.shape
    emb = embedding_table[aspect_ratio_ids]              # (B, T*H)
    emb = emb.reshape(B, T, 1, H)
    if is_gated:
        emb = emb * jnp.tanh(gate)
    return hidden_state + emb


if __name__ == "__main__":
    # Small synthetic config (H a multiple of 128 so output stores are
    # lane-dense; real Mllama H=1280 also satisfies this).
    B = 2                     # batch
    max_num_tiles = 4         # T
    num_patches = 8           # P
    hidden_size = 128         # H
    max_aspect_ratio_id = 8   # embedding table has 9 rows

    key = jax.random.PRNGKey(0)
    k1, k2, k3, k4 = jax.random.split(key, 4)

    hidden_state = jax.random.normal(
        k1, (B, max_num_tiles, num_patches, hidden_size), dtype=jnp.float32)
    aspect_ratio_ids = jax.random.randint(
        k2, (B,), 0, max_aspect_ratio_id + 1, dtype=jnp.int32)
    embedding_table = jax.random.normal(
        k3, (max_aspect_ratio_id + 1, max_num_tiles * hidden_size),
        dtype=jnp.float32)
    # PyTorch inits gate to zeros; use a nonzero value so the gated path is
    # actually exercised numerically.
    gate = jax.random.normal(k4, (1,), dtype=jnp.float32)

    # Gated path
    out = jax.block_until_ready(
        aspect_ratio_embedding(hidden_state, aspect_ratio_ids,
                               embedding_table, gate, is_gated=True))
    ref = reference(hidden_state, aspect_ratio_ids, embedding_table, gate,
                    is_gated=True)
    assert out.shape == hidden_state.shape and out.dtype == hidden_state.dtype
    assert jnp.allclose(out, ref, atol=1e-5, rtol=1e-5), "gated mismatch vs reference"

    # Ungated path (no gate parameter, no tanh scaling)
    out_ug = jax.block_until_ready(
        aspect_ratio_embedding(hidden_state, aspect_ratio_ids,
                               embedding_table, is_gated=False))
    ref_ug = reference(hidden_state, aspect_ratio_ids, embedding_table,
                       is_gated=False)
    assert jnp.allclose(out_ug, ref_ug, atol=1e-5, rtol=1e-5), \
        "ungated mismatch vs reference"

    # Non-divisible patch dim with a deliberately tiny per-block budget:
    # exercises the balance-aware tiling + masked partial last tile
    # (P=20 -> tiles of 8, 8, 4), per the correctness-review concern.
    P2 = 20
    hs2 = jax.random.normal(
        k1, (B, max_num_tiles, P2, hidden_size), dtype=jnp.float32)
    out2 = jax.block_until_ready(
        aspect_ratio_embedding(hs2, aspect_ratio_ids, embedding_table, gate,
                               is_gated=True, target_block_bytes=4096))
    ref2 = reference(hs2, aspect_ratio_ids, embedding_table, gate,
                     is_gated=True)
    assert jnp.allclose(out2, ref2, atol=1e-5, rtol=1e-5), \
        "partial-tile mismatch vs reference"

    print("KERNEL_OK")
</pallas_src>

<mosaic_0001>
module attributes {stable_mosaic.version = 11 : i64} {
  func.func @_aspect_ratio_embed_kernel(%arg0: i32, %arg1: i32, %arg2: i32, %arg3: memref<2xi32, #tpu.memory_space<smem>>, %arg4: memref<1x1x8x128xf32, #tpu.memory_space<vmem>>, %arg5: memref<1x1x1x128xf32, #tpu.memory_space<vmem>>, %arg6: memref<1x1x8x128xf32, #tpu.memory_space<vmem>>) attributes {dimension_semantics = [#tpu.dimension_semantics<parallel>, #tpu.dimension_semantics<parallel>, #tpu.dimension_semantics<parallel>], iteration_bounds = array<i64: 2, 4, 1>, scalar_prefetch = 1 : i64, scratch_operands = 0 : i64, tpu.core_type = #tpu.core_type<tc>, window_params = [{transform_indices = @transform_0, window_bounds = array<i64: 1, 1, 8, 128>}, {transform_indices = @transform_1, window_bounds = array<i64: 1, 1, 1, 128>}, {transform_indices = @transform_2, window_bounds = array<i64: 1, 1, 8, 128>}]} {
    %c0 = arith.constant 0 : index
    %c0_0 = arith.constant 0 : index
    %c0_1 = arith.constant 0 : index
    %c0_2 = arith.constant 0 : index
    %0 = vector.load %arg4[%c0, %c0_0, %c0_1, %c0_2] : memref<1x1x8x128xf32, #tpu.memory_space<vmem>>, vector<1x1x8x128xf32>
    %c0_3 = arith.constant 0 : index
    %c0_4 = arith.constant 0 : index
    %c0_5 = arith.constant 0 : index
    %c0_6 = arith.constant 0 : index
    %1 = vector.load %arg5[%c0_3, %c0_4, %c0_5, %c0_6] : memref<1x1x1x128xf32, #tpu.memory_space<vmem>>, vector<1x1x1x128xf32>
    %2 = vector.broadcast %1 : vector<1x1x1x128xf32> to vector<1x1x8x128xf32>
    %3 = arith.addf %0, %2 : vector<1x1x8x128xf32>
    %c0_7 = arith.constant 0 : index
    %c0_8 = arith.constant 0 : index
    %c0_9 = arith.constant 0 : index
    %c0_10 = arith.constant 0 : index
    %4 = vector.load %arg6[%c0_7, %c0_8, %c0_9, %c0_10] : memref<1x1x8x128xf32, #tpu.memory_space<vmem>>, vector<1x1x8x128xf32>
    tpu.vector_store %arg6[%c0_7, %c0_8, %c0_9, %c0_10], %3 {strides = array<i32>} : memref<1x1x8x128xf32, #tpu.memory_space<vmem>>, vector<1x1x8x128xf32>,
    return
  }
  func.func @transform_0(%arg0: i32, %arg1: i32, %arg2: i32, %arg3: memref<2xi32, #tpu.memory_space<smem>>) -> (i32, i32, i32, i32) {
    %c0_i32 = arith.constant 0 : i32
    %c0_i32_0 = arith.constant 0 : i32
    return %arg0, %arg1, %arg2, %c0_i32 : i32, i32, i32, i32
  }
  func.func @transform_1(%arg0: i32, %arg1: i32, %arg2: i32, %arg3: memref<2xi32, #tpu.memory_space<smem>>) -> (i32, i32, i32, i32) {
    %0 = arith.index_cast %arg0 : i32 to index
    %1 = memref.load %arg3[%0] : memref<2xi32, #tpu.memory_space<smem>>
    %c0_i32 = arith.constant 0 : i32
    %c0_i32_0 = arith.constant 0 : i32
    %c0_i32_1 = arith.constant 0 : i32
    return %1, %arg1, %c0_i32, %c0_i32_0 : i32, i32, i32, i32
  }
  func.func @transform_2(%arg0: i32, %arg1: i32, %arg2: i32, %arg3: memref<2xi32, #tpu.memory_space<smem>>) -> (i32, i32, i32, i32) {
    %c0_i32 = arith.constant 0 : i32
    %c0_i32_0 = arith.constant 0 : i32
    return %arg0, %arg1, %arg2, %c0_i32 : i32, i32, i32, i32
  }
}

</mosaic_0001>

<bundles_post_ra>
// kernel: tpu_custom_call.1
= control target key start
LH: loop header
LB: loop body
LE: loop exit
PB: predicated region body
PF: predicated region fallthrough
CT: control target
= control target key end

     0   :  { %s829_s0 = inlined_call_operand.vmem [shape: s32[2], index: 0, kind: input, shape index: {}]   ;;  %s830_s1 = inlined_call_operand.hbm [shape: f32[2,4,8,128], index: 1, kind: input, shape index: {}, may-alias: {1,3}]   ;;  %s831_s2 = inlined_call_operand.vmem [shape: f32[9,4,1,128], index: 2, kind: input, shape index: {}]   ;;  %s832_s3 = inlined_call_operand.hbm [shape: f32[2,4,8,128], index: 3, kind: output, shape index: {}, may-alias: {1,3}]  }
   0x1   :  { %s8_s14 = sshll.u32 %s829_s0, 4  ;;  %s9_s14 = int_to_ptr.vmem [resolvable:$true] %s8_s14 }
   0x2   :  { %s459_s15 = scalar_lea.vmem %s9_s14, 16  ;;  %p464_p1 = scmp.lt.s32.totalorder %s9_s14, %s9_s14 }
   0x3   :  { %p460_p0 = scmp.ne.s32.totalorder %s9_s14, %s459_s15  ;;  %p465_p2 = scmp.lt.s32.totalorder %s459_s15, %s459_s15 }
   0x5   :  { %p466_p3 = por %p465_p2, %p464_p1 }
   0x7   :  { %p467_p4 = pnand %p466_p3, %p460_p0 }
   0x9   :  { %470 = shalt.err (!%p467_p4)  }
   0xa   :  { %s603_s16 = smov [#allocation3]  }
   0xb   :  { %11 = dma.vmem_to_smem %s9_s14, 16, %s603_s16, [#allocation2] }
   0xc   :  { %561 = dma.done.wait [#allocation2], 16 }
   0xd   :  { %562 = vsyncadd [#allocation2], 4294967280 }
   0xe   :  { %13 = sfence }
   0xf   :  { %14 = vsyncpa [#allocation5], 0 }
  0x10   :  { %16 = vsyncpa [#allocation5 + $0x1], 0 }
  0x11   :  { %17 = vsyncpa [#allocation6], 0 }
  0x12   :  { %19 = vsyncpa [#allocation6 + $0x1], 0  ;;  %s629_s17 = smov 0   ;;  %s631_s0 = smov 0  }
  0x13   :  { %s633_s18 = smov 0   ;;  %s635_s19 = smov 0  }
  0x14   :  { %s637_s20 = smov 0   ;;  %s639_s21 = smov 0  }
  0x15   :  { %s641_s22 = smov 0   ;;  %s643_s23 = smov 0  }
  0x16 LB: > { %s363_s24 = sadd.s32 4294967295, %s601_s23   ;;  %s364_s25 = sadd.s32 4294967294, %s601_s23   ;;  %s601_s23 = sphi %s643_s23, %s25_s23   ;;  %s597_s22 = sphi %s641_s22, %s849_s22   ;;  %s593_s21 = sphi %s639_s21, %s848_s21   ;;  %s589_s20 = sphi %s637_s20, %s847_s20   ;;  %s585_s19 = sphi %s635_s19, %s846_s19   ;;  %s581_s18 = sphi %s633_s18, %s845_s18   ;;  %s577_s0 = sphi %s631_s0, %s844_s0   ;;  %s573_s17 = sphi %s629_s17, %s843_s17  }
  0x17   : > { %s40_s26 = sadd.s32 1, %s593_s21  ;;  %s44_s27 = sadd.s32 1, %s597_s22 }
  0x18   : > { %p42_p5 = scmp.ge.s32.totalorder %s40_s26, 4  ;;  %s55_s28 = sadd.s32 1, %s581_s18 }
  0x19   : > { %p62_p6 = scmp.ne.s32.totalorder %s581_s18, %s577_s0  ;;  %p63_p7 = scmp.eq.s32.totalorder %s601_s23, 0 }
  0x1a   : > { %s851_s26 = smov (%p42_p5, %s40_s26), 0  ;;  %s853_s27 = smov (!%p42_p5, %s44_s27), %s597_s22 }
  0x1b   : > { %s49_s29 = ssub.s32 %s593_s21, %s851_s26  ;;  %p682_p8 = por %p63_p7, %p62_p6 }
  0x1c   : > { %p46_p9 = scmp.ge.s32.totalorder %s853_s27, 2  ;;  %p68_p10 = scmp.ne.s32.totalorder %s577_s0, %s573_s17 }
  0x1d   : > { %p69_p11 = scmp.eq.s32.totalorder %s363_s24, 0  ;;  %p126_p12 = scmp.eq.s32.totalorder %s363_s24, 7 }
  0x1e   : > { %s855_s27 = smov (%p46_p9, %s853_s27), 0  ;;  %p132_p1 = scmp.eq.s32.totalorder %s364_s25, 7 }
  0x1f   : > { %p690_p13 = por %p69_p11, %p68_p10  ;;  %p694_p0 = por %p126_p12, %p62_p6 }
  0x20   : > { %s48_s6 = ssub.s32 %s597_s22, %s855_s27  ;;  %p700_p3 = por %p132_p1, %p68_p10 }
  0x21   : > { %s836_s5 = scalar_select %p694_p0, 1, 0 }
  0x22   : > { %s50_s7 = sor.u32 %s49_s29, %s48_s6  ;;  %p392_p4 = scmp.lt.s32.totalorder %s601_s23, 8 }
  0x23   : > { %p53_p2 = scmp.eq.s32.totalorder %s50_s7, 0  ;;  %s152_s9 = sand.u32 1, %s581_s18  }
  0x24   : > { %s837_s8 = scalar_select %p700_p3, 1, 0 }
  0x25   : > { %s707_s10 = scalar_select %p53_p2, %s581_s18, %s55_s28  }
  0x26   : > { %s367_s11 = sshll.u32 %s152_s9, 3  ;;  %s368_s12 = sshll.u32 %s597_s22, 2 }
  0x27   : > { %s162_s13 = sadd.s32 %s593_s21, %s368_s12  ;;  %s156_s14 = scalar_lea.vmem [#allocation4], %s367_s11 }
  0x28   : > { %s166_s15 = sshll.u32 %s156_s14, 4  ;;  %s369_s16 = sshll.u32 %s162_s13, 7  ;;  %s711_s15 = int_to_ptr.vmem [resolvable:$true] %s166_s15 }
  0x29   : > { %s716_s29 = scalar_lea.hbm %s830_s1, %s369_s16  ;;  %p720_p5 = pnand %p392_p4, %p682_p8 }
  0x2a   : > { %s153_s6 = scalar_lea.sflag [#allocation5], %s152_s9  ;;  %s471_s7 = scalar_lea.hbm %s716_s29, 128 }
  0x2b   : > { %p472_p9 = scmp.ne.s32.totalorder %s716_s29, %s471_s7  ;;  %p473_p10 = pneg %p720_p5 }
  0x2c   : > { %s476_s12 = scalar_lea.hbm %s830_s1, 1024  ;;  %p477_p8 = scmp.lt.u32.totalorder %s716_s29, %s830_s1 }
  0x2d   : > { %p474_p11 = pnand %p473_p10, %p472_p9  ;;  %p478_p1 = scmp.lt.u32.totalorder %s476_s12, %s471_s7 }
  0x2e   : > { %p480_p4 = scmp.lt.u32.totalorder %s471_s7, %s716_s29 }
  0x2f   : > { %p475_p12 = pneg %p474_p11  ;;  %p479_p2 = por %p478_p1, %p477_p8 }
  0x31   : > { %p481_p6 = por %p480_p4, %p479_p2 }
  0x33   : > { %p482_p7 = pnand %p481_p6, %p475_p12 }
  0x35   : > { %485 = shalt.err (!%p482_p7)
}
  0x36   : > { %s486_s9 = scalar_lea.vmem %s711_s15, 128  ;;  %s604_s16 = smov [#allocation4]  }
  0x37   : > { %p487_p9 = scmp.ne.s32.totalorder %s711_s15, %s486_s9  ;;  %s491_s24 = sshll.u32 %s604_s16, 4  ;;  %s492_s24 = int_to_ptr.vmem [resolvable:$false] %s491_s24 }
  0x38   : > { %s493_s25 = scalar_lea.vmem %s492_s24, 256  ;;  %p494_p0 = scmp.lt.s32.totalorder %s711_s15, %s492_s24 }
  0x39   : > { %p489_p11 = pnand %p487_p9, %p473_p10  ;;  %p495_p8 = scmp.lt.s32.totalorder %s493_s25, %s486_s9 }
  0x3b   : > { %p490_p3 = pneg %p489_p11  ;;  %p496_p1 = por %p495_p8, %p494_p0 }
  0x3d   : > { %p497_p2 = pnand %p496_p1, %p490_p3 }
  0x3f   : > { %500 = shalt.err (!%p497_p2)
}
  0x40   : > { %387 = dma.hbm_to_vmem [thread:$0]  (!%p720_p5), %s716_s29, 128, %s711_s15, %s153_s6  }
  0x41   : > { %p839_p6 = scmp.lt.s32.totalorder %s601_s23, 9  ;;  %p840_p7 = scmp.ge.s32.totalorder %s601_s23, 1 }
  0x43   : > { %p184_p10 = pnand %p840_p7, %p839_p6 }
  0x44   : > { %s756_s7 = sand.u32 (!%p184_p10), 1, %s577_s0  }
  0x45   : > { %187 = sbr.rel (%p184_p10) target bundleno = 109 (0x6d), region = 28  ;;  %s371_s30 = sshll.u32 (!%p184_p10), %s756_s7, 3 }
  0x46   : > { %s190_s11 = scalar_lea.sflag (!%p184_p10), [#allocation5], %s756_s7  ;;  %s193_s12 = scalar_lea.vmem (!%p184_p10), [#allocation4], %s371_s30 }
  0x4c   : > { %564 = dma.done.wait (%p690_p13), %s190_s11, 128  }
  0x4d   : > { %566 = vsyncadd (%p690_p13), %s190_s11, 4294967168  ;;  %s222_s15 = sld [smem:[#allocation3 + %s589_s20]]  ;;  %p225_p0 = scmp.lt.s32.totalorder %s585_s19, 3  ;;  %v231_v0 = vld [vmem:[%s193_s12] sm:$0xff] }
  0x4e   : > { %s376_s29 = sshll.u32 %s589_s20, 2  ;;  %s221_s14 = scalar_lea.vmem [#allocation7], %s371_s30 }
  0x4f   : > { %s226_s28 = scalar_select %p225_p0, %s585_s19, 3 }
  0x50   : > { %s254_s6 = sadd.s32 %s585_s19, %s376_s29  ;;  %s258_s9 = sshll.u32 %s221_s14, 4  ;;  %s772_s9 = int_to_ptr.vmem [resolvable:$true] %s258_s9 }
  0x51   : > { %s377_s4 = sshll.u32 %s254_s6, 7  ;;  %s242_s30 = scalar_lea.sflag [#allocation6], %s756_s7 }
  0x52   : > { %s501_s12 = scalar_lea.vmem %s772_s9, 128  ;;  %p841_p5 = scmp.ne.s32.totalorder %s836_s5, 0 }
  0x53   : > { %p223_p3 = scmp.lt.s32.totalorder %s222_s15, 8  ;;  %p502_p13 = scmp.ne.s32.totalorder %s772_s9, %s501_s12 }
  0x54   : > { %s605_s29 = smov [#allocation7]  }
  0x55   : > { %s857_s15 = smov (!%p223_p3, %s222_s15), 8  ;;  %p503_p12 = pnand %p502_p13, %p841_p5 }
  0x56   : > { %s373_s13 = sshll.u32 %s857_s15, 2  ;;  %s777_s15 = scalar_lea.hbm %s832_s3, %s377_s4 }
  0x57   : > { %s228_s16 = sadd.s32 %s373_s13, %s226_s28  ;;  %p504_p4 = pneg %p503_p12 }
  0x58   : > { %s229_s11 = scalar_lea.vmem %s831_s2, %s228_s16  ;;  %s505_s28 = sshll.u32 %s605_s29, 4  ;;  %s506_s28 = int_to_ptr.vmem [resolvable:$false] %s505_s28 }
  0x59   : > { %v374_v1 = vld [vmem:[%s229_s11] ss:$0 sm:$0xff]  ;;  %s507_s6 = scalar_lea.vmem %s506_s28, 256  ;;  %p508_p9 = scmp.lt.s32.totalorder %s772_s9, %s506_s28 }
  0x5a   : > { %v239_v2 = vadd.f32 %v374_v1, %v231_v0  ;;  %p509_p11 = scmp.lt.s32.totalorder %s507_s6, %s501_s12 }
  0x5c   : > { %240 = vst [vmem:[%s221_s14] sm:$0xff] %v239_v2  ;;  %p510_p8 = por %p509_p11, %p508_p9 }
  0x5e   : > { %p511_p1 = pnand %p510_p8, %p504_p4 }
  0x60   : > { %514 = shalt.err (!%p511_p1)
}
  0x61   : > { %s515_s7 = scalar_lea.hbm %s777_s15, 128  ;;  %s519_s16 = scalar_lea.hbm %s832_s3, 1024 }
  0x62   : > { %p516_p2 = scmp.ne.s32.totalorder %s777_s15, %s515_s7  ;;  %p520_p10 = scmp.lt.u32.totalorder %s777_s15, %s832_s3 }
  0x63   : > { %p521_p0 = scmp.lt.u32.totalorder %s519_s16, %s515_s7  ;;  %p523_p13 = scmp.lt.u32.totalorder %s515_s7, %s777_s15 }
  0x64   : > { %p517_p6 = pnand %p516_p2, %p841_p5 }
  0x65   : > { %p522_p3 = por %p521_p0, %p520_p10 }
  0x66   : > { %p518_p7 = pneg %p517_p6 }
  0x67   : > { %p524_p12 = por %p523_p13, %p522_p3 }
  0x69   : > { %p525_p4 = pnand %p524_p12, %p518_p7 }
  0x6b   : > { %528 = shalt.err (!%p525_p4)
}
  0x6c   : > { %382 = dma.vmem_to_hbm [thread:$0]  (%p841_p5), %s772_s9, 128, %s777_s15, %s242_s30  }
  0x6d PF: > { %p393_p9 = scmp.ge.s32.totalorder %s601_s23, 2  ;;  %s270_s25 = sand.u32 1, %s573_s17  }
  0x6e   : > { %p842_p11 = scmp.ne.s32.totalorder %s837_s8, 0  ;;  %s271_s11 = scalar_lea.sflag [#allocation6], %s270_s25 }
  0x70   : > { %p389_p8 = pnand %p393_p9, %p842_p11 }
  0x72   : > { %568 = dma.done.wait (!%p389_p8), %s271_s11, 128  }
  0x73   : > { %570 = vsyncadd (!%p389_p8), %s271_s11, 4294967168  ;;  %s25_s23 = sadd.s32 1, %s601_s23   ;;  %s843_s17 = smov %s577_s0 }
  0x74   : > { %p22_p1 = scmp.ge.s32.totalorder %s25_s23, 10   ;;  %s844_s0 = smov %s581_s18 }
  0x75   : > { %s845_s18 = smov %s707_s10  ;;  %s846_s19 = smov %s593_s21 }
  0x76   : > { %s847_s20 = smov %s597_s22  ;;  %s848_s21 = smov %s851_s26 }
  0x77   : > { %s849_s22 = smov %s855_s27  ;;  %24 = sbr.rel (!%p22_p1) target bundleno = 22 (0x16), region = 76 }
  0x7e   :  { %276 = vsyncpa [#allocation5], 1 }
  0x7f   :  { %278 = vsyncpa [#allocation5 + $0x1], 1 }
  0x80   :  { %279 = vsyncpa [#allocation6], 1 }
  0x81   :  { %281 = vsyncpa [#allocation6 + $0x1], 1 }

</bundles_post_ra>
